<compile_context>
chip_gen: v6e
topology: v6e:2x2x1
jax: 0.10.0
libtpu: 0.0.40
codegen_flags: <defaults>
</compile_context>

<pallas_src>
import jax
import jax.numpy as jnp
from jax.experimental import pallas as pl
from jax.experimental.pallas import tpu as pltpu


def _round_up(n: int, m: int) -> int:
    return ((n + m - 1) // m) * m


def _sublane_multiple(dtype) -> int:
    itemsize = jnp.dtype(dtype).itemsize
    if itemsize >= 4:
        return 8
    if itemsize == 2:
        return 16
    return 32


def _vmem_limit_bytes() -> int:
    # ~85% of physical per-TensorCore VMEM (leaves headroom for compiler
    # scratch / semaphores); safe fallback for any generation if the query
    # is unavailable.
    try:
        cap = pltpu.get_tpu_info().vmem_capacity_bytes
        return int(cap * 0.85)
    except Exception:
        return 48 << 20


def _residual_kernel_resident(x_ref, wt_ref, b_ref, o_ref):
    # x_ref : (TM, D)  activation row tile (double-buffered / pipelined)
    # wt_ref: (D, D)   weight pre-transposed to (D_in, D_out), VMEM-resident
    # b_ref : (1, D)   bias, VMEM-resident
    # o_ref : (TM, D)  output tile
    x = x_ref[...]
    y = jnp.dot(x, wt_ref[...], preferred_element_type=jnp.float32)
    y = y + b_ref[...].astype(jnp.float32)
    o_ref[...] = (y + x.astype(jnp.float32)).astype(o_ref.dtype)


def _residual_kernel_split(x_ref, xr_ref, wt_ref, b_ref, o_ref):
    # Large-D path: D_out tiled by TN.
    # x_ref : (TM, D)   full activation row tile (contraction input)
    # xr_ref: (TM, TN)  column slice of x for the residual add
    # wt_ref: (D, TN)   weight column tile
    # b_ref : (1, TN)   bias tile
    # o_ref : (TM, TN)  output tile
    y = jnp.dot(x_ref[...], wt_ref[...], preferred_element_type=jnp.float32)
    y = y + b_ref[...].astype(jnp.float32)
    o_ref[...] = (y + xr_ref[...].astype(jnp.float32)).astype(o_ref.dtype)


def residual_linear(x, weight, bias, *, tm_max=None):
    """out = x @ weight.T + bias + x  (fn = nn.Linear(D, D), PyTorch layout).

    x: (..., D); weight: (D_out=D, D_in=D); bias: (D,)."""
    orig_shape = x.shape
    D = orig_shape[-1]
    N = 1
    for s in orig_shape[:-1]:
        N *= s
    x2 = x.reshape(N, D)

    # One-time wrapper-side transpose to (D_in, D_out); the in-kernel
    # contraction is then a plain (1,),(0,) MXU matmul (no per-tile vxpose).
    wt = jnp.transpose(weight)
    b2 = bias.reshape(1, D)

    in_dtype = x.dtype
    itemsize = jnp.dtype(in_dtype).itemsize
    w_itemsize = jnp.dtype(weight.dtype).itemsize
    sub = _sublane_multiple(in_dtype)

    vmem_limit = _vmem_limit_bytes()
    headroom = 2 << 20
    if tm_max is None:
        # Bigger row tiles on 128-MiB-VMEM parts (v5e/v6e); 256-multiples
        # are still preferred on v7x but capped lower (64 MiB VMEM).
        tm_max = 1024 if vmem_limit > (80 << 20) else 512

    cost = pl.CostEstimate(
        flops=2 * N * D * D + 2 * N * D,
        transcendentals=0,
        bytes_accessed=(N * D * itemsize            # x read
                        + N * D * itemsize          # out write
                        + D * D * w_itemsize        # weight
                        + D * jnp.dtype(bias.dtype).itemsize),
    )

    # Can the single-buffered weight stay VMEM-resident with room for tiles?
    weight_bytes = D * D * w_itemsize
    bias_bytes = 8 * _round_up(D, 128) * jnp.dtype(bias.dtype).itemsize
    avail = vmem_limit - headroom - weight_bytes - bias_bytes
    min_tile_bytes = 4 * sub * D * itemsize          # x + out, double-buffered

    if avail >= min_tile_bytes:
        # ---------------- resident-weight path ----------------
        tm_budget = avail // (4 * D * itemsize)
        tm = min(tm_max, tm_budget, _round_up(N, sub))
        if tm >= 128:
            tm = (tm // 128) * 128
        else:
            tm = max((tm // sub) * sub, sub)
        # Use >= 2 row tiles when N is big enough so megacore can shard them.
        if tm >= N and N > 256:
            tm = max(128, _round_up(pl.cdiv(N, 2), 128))
        grid_m = pl.cdiv(N, tm)

        out = pl.pallas_call(
            _residual_kernel_resident,
            out_shape=jax.ShapeDtypeStruct((N, D), in_dtype),
            grid_spec=pltpu.PrefetchScalarGridSpec(
                num_scalar_prefetch=0,
                grid=(grid_m,),
                in_specs=[
                    pl.BlockSpec((tm, D), lambda i: (i, 0)),       # x tile
                    pl.BlockSpec((D, D), lambda i: (0, 0),
                                 pipeline_mode=pl.Buffered(1)),    # weight
                    pl.BlockSpec((1, D), lambda i: (0, 0),
                                 pipeline_mode=pl.Buffered(1)),    # bias
                ],
                out_specs=pl.BlockSpec((tm, D), lambda i: (i, 0)),
            ),
            compiler_params=pltpu.CompilerParams(
                dimension_semantics=("parallel",),
                vmem_limit_bytes=vmem_limit,
            ),
            cost_estimate=cost,
        )(x2, wt, b2)
    else:
        # ---------------- large-D path: tile D_out by TN ----------------
        tm = min(256, _round_up(N, sub))
        if tm >= 128:
            tm = (tm // 128) * 128
        else:
            tm = max((tm // sub) * sub, sub)
        # Budget: x row tile (TM, D) dbl-buffered is fixed; weight (D, TN),
        # residual x cols (TM, TN) and out (TM, TN) scale with TN.
        fixed = 2 * tm * D * itemsize
        per_tn = 2 * D * w_itemsize + 2 * tm * itemsize + 2 * tm * itemsize
        tn_budget = max((vmem_limit - headroom - fixed) // per_tn, 128)
        tn = min((tn_budget // 128) * 128, _round_up(D, 128))
        grid = (pl.cdiv(N, tm), pl.cdiv(D, tn))

        out = pl.pallas_call(
            _residual_kernel_split,
            out_shape=jax.ShapeDtypeStruct((N, D), in_dtype),
            grid_spec=pltpu.PrefetchScalarGridSpec(
                num_scalar_prefetch=0,
                grid=grid,
                in_specs=[
                    pl.BlockSpec((tm, D), lambda i, j: (i, 0)),    # x rows
                    pl.BlockSpec((tm, tn), lambda i, j: (i, j)),   # x cols (res)
                    pl.BlockSpec((D, tn), lambda i, j: (0, j)),    # weight cols
                    pl.BlockSpec((1, tn), lambda i, j: (0, j)),    # bias cols
                ],
                out_specs=pl.BlockSpec((tm, tn), lambda i, j: (i, j)),
            ),
            compiler_params=pltpu.CompilerParams(
                dimension_semantics=("parallel", "arbitrary"),
                vmem_limit_bytes=vmem_limit,
            ),
            cost_estimate=cost,
        )(x2, x2, wt, b2)

    return out.reshape(orig_shape)


def residual_reference(x, weight, bias):
    return x @ weight.T + bias + x


if __name__ == "__main__":
    key = jax.random.PRNGKey(0)
    k_x, k_w, k_b = jax.random.split(key, 3)

    B, S, D = 2, 8, 32
    x = jax.random.normal(k_x, (B, S, D), dtype=jnp.float32)

    # fn = Linear(D, D) parameters in native PyTorch (D_out, D_in) layout.
    weight = jax.random.normal(k_w, (D, D), dtype=jnp.float32) * 0.02
    bias = jax.random.normal(k_b, (D,), dtype=jnp.float32) * 0.02

    out = residual_linear(x, weight, bias)
    jax.block_until_ready(out)

    ref = residual_reference(x, weight, bias)
    assert out.shape == (B, S, D)
    assert jnp.allclose(out, ref, atol=1e-4, rtol=1e-4), "mismatch vs reference"

    print("KERNEL_OK")
</pallas_src>

<mosaic_0001>
module attributes {stable_mosaic.version = 11 : i64} {
  func.func @_residual_kernel_resident(%arg0: i32, %arg1: memref<16x32xf32, #tpu.memory_space<vmem>>, %arg2: memref<32x32xf32, #tpu.memory_space<vmem>>, %arg3: memref<1x32xf32, #tpu.memory_space<vmem>>, %arg4: memref<16x32xf32, #tpu.memory_space<vmem>>) attributes {dimension_semantics = [#tpu.dimension_semantics<parallel>], iteration_bounds = array<i64: 1>, scalar_prefetch = 0 : i64, scratch_operands = 0 : i64, tpu.core_type = #tpu.core_type<tc>, window_params = [{transform_indices = @transform_0, window_bounds = array<i64: 16, 32>}, {pipeline_mode = #tpu.pipeline_mode<synchronous>, transform_indices = @transform_1, window_bounds = array<i64: 32, 32>}, {pipeline_mode = #tpu.pipeline_mode<synchronous>, transform_indices = @transform_2, window_bounds = array<i64: 1, 32>}, {transform_indices = @transform_3, window_bounds = array<i64: 16, 32>}]} {
    %c0 = arith.constant 0 : index
    %c0_0 = arith.constant 0 : index
    %0 = vector.load %arg1[%c0, %c0_0] : memref<16x32xf32, #tpu.memory_space<vmem>>, vector<16x32xf32>
    %c0_1 = arith.constant 0 : index
    %c0_2 = arith.constant 0 : index
    %1 = vector.load %arg2[%c0_1, %c0_2] : memref<32x32xf32, #tpu.memory_space<vmem>>, vector<32x32xf32>
    %cst = arith.constant dense<0.000000e+00> : vector<16x32xf32>
    %2 = tpu.matmul %0, %1, %cst {dimension_numbers = #tpu.dot_dimension_numbers<[1], [0], [0], [1], [0, 0, 1, 1], [], []>} : vector<16x32xf32>, vector<32x32xf32>, vector<16x32xf32> -> vector<16x32xf32>
    %c0_3 = arith.constant 0 : index
    %c0_4 = arith.constant 0 : index
    %3 = vector.load %arg3[%c0_3, %c0_4] : memref<1x32xf32, #tpu.memory_space<vmem>>, vector<1x32xf32>
    %4 = vector.broadcast %3 : vector<1x32xf32> to vector<16x32xf32>
    %5 = arith.addf %2, %4 : vector<16x32xf32>
    %6 = arith.addf %5, %0 : vector<16x32xf32>
    %c0_5 = arith.constant 0 : index
    %c0_6 = arith.constant 0 : index
    %7 = vector.load %arg4[%c0_5, %c0_6] : memref<16x32xf32, #tpu.memory_space<vmem>>, vector<16x32xf32>
    tpu.vector_store %arg4[%c0_5, %c0_6], %6 {strides = array<i32>} : memref<16x32xf32, #tpu.memory_space<vmem>>, vector<16x32xf32>,
    return
  }
  func.func @transform_0(%arg0: i32) -> (i32, i32) {
    %c0_i32 = arith.constant 0 : i32
    %c0_i32_0 = arith.constant 0 : i32
    return %arg0, %c0_i32 : i32, i32
  }
  func.func @transform_1(%arg0: i32) -> (i32, i32) {
    %c0_i32 = arith.constant 0 : i32
    %c0_i32_0 = arith.constant 0 : i32
    %c0_i32_1 = arith.constant 0 : i32
    return %c0_i32, %c0_i32_0 : i32, i32
  }
  func.func @transform_2(%arg0: i32) -> (i32, i32) {
    %c0_i32 = arith.constant 0 : i32
    %c0_i32_0 = arith.constant 0 : i32
    %c0_i32_1 = arith.constant 0 : i32
    return %c0_i32, %c0_i32_0 : i32, i32
  }
  func.func @transform_3(%arg0: i32) -> (i32, i32) {
    %c0_i32 = arith.constant 0 : i32
    %c0_i32_0 = arith.constant 0 : i32
    return %arg0, %c0_i32 : i32, i32
  }
}

</mosaic_0001>

<bundles_post_ra>
// kernel: tpu_custom_call.1
= control target key start
LH: loop header
LB: loop body
LE: loop exit
PB: predicated region body
PF: predicated region fallthrough
CT: control target
= control target key end

     0   :  { %8 = vsyncpa [#allocation3], 0  ;;  %s301_s0 = inlined_call_operand.hbm [shape: f32[16,32], index: 0, kind: input, shape index: {}]   ;;  %s302_s1 = inlined_call_operand.hbm [shape: f32[32,32], index: 1, kind: input, shape index: {}]   ;;  %s303_s2 = inlined_call_operand.vmem [shape: f32[1,32], index: 2, kind: input, shape index: {}]   ;;  %s304_s3 = inlined_call_operand.hbm [shape: f32[16,32], index: 3, kind: output, shape index: {}]  }
   0x1   :  { %9 = vsyncpa [#allocation6], 0 }
   0x2   :  { %10 = vsyncpa [#allocation4], 0  ;;  %s251_s12 = smov [#allocation2]  }
   0x3   :  { %s16_s13 = sshll.u32 %s251_s12, 4  ;;  %s17_s13 = int_to_ptr.vmem [resolvable:$true] %s16_s13 }
   0x4   :  { %s193_s14 = scalar_lea.vmem %s17_s13, 256  ;;  %p198_p1 = scmp.lt.s32.totalorder %s17_s13, %s17_s13 }
   0x5   :  { %p194_p0 = scmp.ne.s32.totalorder %s17_s13, %s193_s14  ;;  %p199_p2 = scmp.lt.s32.totalorder %s193_s14, %s193_s14 }
   0x7   :  { %p200_p3 = por %p199_p2, %p198_p1 }
   0x9   :  { %p201_p4 = pnand %p200_p3, %p194_p0 }
   0xb   :  { %204 = shalt.err (!%p201_p4)
}
   0xc   :  { %s252_s15 = smov 128   ;;  %s253_s16 = smov 8  }
   0xd   :  { %22 = dma.hbm_to_vmem [thread:$0]  %s301_s0, 256, %s17_s13, [#allocation3], %s252_s15, %s252_s15, %s253_s16  }
   0xe   :  { %s254_s19 = smov [#allocation5]  }
   0xf   :  { %s28_s20 = sshll.u32 %s254_s19, 4  ;;  %s29_s20 = int_to_ptr.vmem [resolvable:$true] %s28_s20 }
  0x10   :  { %s213_s21 = scalar_lea.vmem %s29_s20, 512  ;;  %p218_p6 = scmp.lt.s32.totalorder %s29_s20, %s29_s20 }
  0x11   :  { %p214_p5 = scmp.ne.s32.totalorder %s29_s20, %s213_s21  ;;  %p219_p7 = scmp.lt.s32.totalorder %s213_s21, %s213_s21 }
  0x13   :  { %p220_p8 = por %p219_p7, %p218_p6 }
  0x15   :  { %p221_p9 = pnand %p220_p8, %p214_p5 }
  0x17   :  { %224 = shalt.err (!%p221_p9)
}
  0x18   :  { %34 = dma.hbm_to_vmem [thread:$0]  %s302_s1, 512, %s29_s20, [#allocation6], %s252_s15, %s252_s15, %s253_s16  }
  0x19   :  { %245 = dma.done.wait [#allocation3], 256  }
  0x1a   :  { %246 = vsyncadd [#allocation3], 4294967040 }
  0x1b   :  { %247 = dma.done.wait [#allocation6], 512  }
  0x1c   :  { %248 = vsyncadd [#allocation6], 4294966784  ;;  %vm56_vm0 = vcmask 261120   ;;  %v48_v0 = vld [vmem:[#allocation5 + $0x18] sm:$0xff]  ;;  %v47_v1 = vld [vmem:[#allocation5 + $0x10] sm:$0xff]  ;;  %s255_s24 = smov [#allocation7]  }
  0x1d   :  { %169 = vmatprep.subr.mxu0 %v48_v0  ;;  %v43_v2 = vld [vmem:[#allocation2] sm:$0xff]  ;;  %v46_v3 = vld [vmem:[#allocation5 + $0x8] sm:$0xff]  ;;  %v45_v4 = vld [vmem:[#allocation5] sm:$0xff]  ;;  %s147_s25 = sshll.u32 %s255_s24, 4  ;;  %s148_s25 = int_to_ptr.vmem [resolvable:$true] %s147_s25 }
  0x1e   :  { %170 = vmatpush3.msra.mxu0 %v48_v0  ;;  %177 = vmatprep.mubr.msk.f32.mxu0 %vm56_vm0, %v43_v2  ;;  %v44_v5 = vld [vmem:[#allocation2 + $0x8] sm:$0xff]  ;;  %v160_v6 = vld [vmem:[%s303_s2] ss:$0 sm:$0xff]  ;;  %s225_s26 = scalar_lea.vmem %s148_s25, 256  ;;  %p230_p11 = scmp.lt.s32.totalorder %s148_s25, %s148_s25 }
  0x1f   :  { %171 = vmatprep.subr.mxu0 %v47_v1  ;;  %p226_p10 = scmp.ne.s32.totalorder %s148_s25, %s225_s26  ;;  %p231_p12 = scmp.lt.s32.totalorder %s225_s26, %s225_s26 }
  0x20   :  { %172 = vmatpush3.msra.mxu0 %v47_v1 }
  0x21   :  { %173 = vmatprep.subr.mxu0 %v46_v3  ;;  %p232_p13 = por %p231_p12, %p230_p11 }
  0x22   :  { %174 = vmatpush3.msra.mxu0 %v46_v3 }
  0x23   :  { %175 = vmatprep.subr.mxu0 %v45_v4  ;;  %p233_p0 = pnand %p232_p13, %p226_p10 }
  0x24   :  { %176 = vmatpush3.msra.mxu0 %v45_v4 }
  0x25   :  { %178 = vmatmul.mubr.msk.f32.vlgmr.msra.gmra.mxu0 %vm56_vm0, %v44_v5 }
  0xe5   :  { %v179_v7 = vpop.f32.mrf.mxu0 }
  0xe6   :  { %v135_v8 = vadd.f32 %v179_v7, %v160_v6 }
  0xe7   :  { %v129_v9 = vpop.f32.mrf.mxu0 }
  0xe8   :  { %v139_v10 = vadd.f32 %v135_v8, %v44_v5  ;;  %v130_v11 = vadd.f32 %v160_v6, %v129_v9 }
  0xea   :  { %141 = vst.msk [vmem:[#allocation7 + $0x8] sm:$0xff] %vm56_vm0, %v139_v10  ;;  %v138_v12 = vadd.f32 %v130_v11, %v43_v2 }
  0xec   :  { %140 = vst.msk [vmem:[#allocation7] sm:$0xff] %vm56_vm0, %v138_v12 }
  0xed   :  { %236 = shalt.err (!%p233_p0)
}
  0xee   :  { %153 = dma.vmem_to_hbm [thread:$0]  %s148_s25, 256, %s304_s3, [#allocation4], %s252_s15, %s252_s15, %s253_s16  }
  0xef   :  { %249 = dma.done.wait [#allocation4], 256  }
  0xf0   :  { %250 = vsyncadd [#allocation4], 4294967040 }
  0xf1   :  { %157 = vsyncpa [#allocation3], 1 }
  0xf2   :  { %158 = vsyncpa [#allocation6], 1 }
  0xf3   :  { %159 = vsyncpa [#allocation4], 1 }

</bundles_post_ra>
